<compile_context>
chip_gen: v7x
topology: tpu7x:2x2x1
jax: 0.10.0
libtpu: 0.0.40
codegen_flags: <defaults>
</compile_context>

<pallas_src>
import functools

import jax
import jax.numpy as jnp
from jax.experimental import pallas as pl
from jax.experimental.pallas import tpu as pltpu

INP = 784
HID = 100         # real latent width (PyTorch semantics)
HID_PAD = 128     # lane-aligned hidden width used inside the kernel
OUT = 784


def _round_up(n, m):
    return ((n + m - 1) // m) * m


def autoencoder_kernel(x_ref, w1_ref, b1_ref, w2_ref, b2_ref, lat_ref, out_ref):
    # Both Linear layers fused on one batch tile; weights stay VMEM-resident
    # across grid steps (constant index_maps).
    x = x_ref[...].astype(jnp.bfloat16)                                    # (TB, INP)
    latent = jnp.dot(x, w1_ref[...],
                     preferred_element_type=jnp.float32) + b1_ref[...]     # (TB, HID_PAD) f32
    # Store the real 100-wide latent straight from the kernel (no wrapper
    # re-slice / extra HBM pass). Padded cols 100..127 are exactly zero.
    lat_ref[...] = latent[:, :HID].astype(lat_ref.dtype)
    output = jnp.dot(latent.astype(jnp.bfloat16), w2_ref[...],
                     preferred_element_type=jnp.float32) + b2_ref[...]     # (TB, OUT) f32
    out_ref[...] = output.astype(out_ref.dtype)


@functools.partial(jax.jit, static_argnames=("block_b",))
def net_forward(x, w1_t, b1, w2_t, b2, *, block_b=512):
    """Autoencoder forward pass.

    x    : (B, INP)        f32
    w1_t : (INP, HID_PAD)  bf16   encoder weight, transposed + zero-padded cols
    b1   : (1, HID_PAD)    f32    zero-padded
    w2_t : (HID_PAD, OUT)  bf16   decoder weight, transposed + zero-padded rows
    b2   : (1, OUT)        f32
    Returns (latent (B, HID) f32, output (B, OUT) f32) — same semantics as Net.
    """
    B = x.shape[0]
    # Batch tile: multiple of 8 rows (sublane), at most block_b, and chosen so
    # the grid has at least 2 steps when B allows it (keeps both v7x TCs busy).
    bp8 = _round_up(B, 8)
    tb = min(block_b, max(8, _round_up((bp8 + 1) // 2, 8)))
    bp = _round_up(B, tb)
    if bp != B:
        x = jnp.pad(x, ((0, bp - B), (0, 0)))
    grid = (bp // tb,)

    cost = pl.CostEstimate(
        flops=2 * bp * (INP * HID_PAD + HID_PAD * OUT),
        transcendentals=0,
        bytes_accessed=(w1_t.size * 2 + w2_t.size * 2
                        + b1.size * 4 + b2.size * 4
                        + bp * INP * 4 + bp * HID * 4 + bp * OUT * 4),
    )

    latent_p, output_p = pl.pallas_call(
        autoencoder_kernel,
        out_shape=(
            jax.ShapeDtypeStruct((bp, HID), jnp.float32),
            jax.ShapeDtypeStruct((bp, OUT), jnp.float32),
        ),
        grid=grid,
        in_specs=[
            pl.BlockSpec((tb, INP), lambda i: (i, 0)),        # batch tile of x
            pl.BlockSpec((INP, HID_PAD), lambda i: (0, 0)),   # resident weights/biases
            pl.BlockSpec((1, HID_PAD), lambda i: (0, 0)),
            pl.BlockSpec((HID_PAD, OUT), lambda i: (0, 0)),
            pl.BlockSpec((1, OUT), lambda i: (0, 0)),
        ],
        out_specs=(
            pl.BlockSpec((tb, HID), lambda i: (i, 0)),        # full 100-wide last dim
            pl.BlockSpec((tb, OUT), lambda i: (i, 0)),
        ),
        compiler_params=pltpu.CompilerParams(
            dimension_semantics=("parallel",),   # megacore sharding on v7x
            vmem_limit_bytes=32 * 1024 * 1024,   # headroom for tb up to 1024 on v5e
        ),
        cost_estimate=cost,
    )(x, w1_t, b1, w2_t, b2)

    # Strip batch padding only (free when bp == B); latent is already (*, HID).
    return latent_p[:B], output_p[:B]


def init_params(key):
    """Deterministic init mimicking PyTorch nn.Linear default
    (U[-1/sqrt(fan_in), 1/sqrt(fan_in)]), stored as (in, out) = W.T."""
    k1, k2, k3, k4 = jax.random.split(key, 4)
    bound1 = 1.0 / jnp.sqrt(float(INP))
    bound2 = 1.0 / jnp.sqrt(float(HID))
    w1_t = jax.random.uniform(k1, (INP, HID), jnp.float32, -bound1, bound1)
    b1 = jax.random.uniform(k2, (1, HID), jnp.float32, -bound1, bound1)
    w2_t = jax.random.uniform(k3, (HID, OUT), jnp.float32, -bound2, bound2)
    b2 = jax.random.uniform(k4, (1, OUT), jnp.float32, -bound2, bound2)
    return w1_t, b1, w2_t, b2


def prepare_params(w1_t, b1, w2_t, b2):
    """Zero-pad HID -> HID_PAD and cast weights to bf16 for the kernel.
    Padded weight cols/rows and bias lanes are zero, so results are unchanged."""
    w1_p = jnp.zeros((INP, HID_PAD), jnp.float32).at[:, :HID].set(w1_t).astype(jnp.bfloat16)
    b1_p = jnp.zeros((1, HID_PAD), jnp.float32).at[:, :HID].set(b1)
    w2_p = jnp.zeros((HID_PAD, OUT), jnp.float32).at[:HID, :].set(w2_t).astype(jnp.bfloat16)
    return w1_p, b1_p, w2_p, b2


if __name__ == "__main__":
    key = jax.random.PRNGKey(0)
    kx, kp = jax.random.split(key)

    w1_t, b1, w2_t, b2 = init_params(kp)
    w1_p, b1_p, w2_p, b2_p = prepare_params(w1_t, b1, w2_t, b2)

    def ref_forward(xx):
        lat = xx @ w1_t + b1
        out = lat @ w2_t + b2
        return lat, out

    # Small batch: tb=8, grid=(2,) — exercises the >=2-step grid logic.
    B = 16
    x = jax.random.normal(kx, (B, INP), jnp.float32)
    latent, output = net_forward(x, w1_p, b1_p, w2_p, b2_p)
    jax.block_until_ready((latent, output))
    lat_ref, out_ref = ref_forward(x)
    assert latent.shape == (B, HID) and output.shape == (B, OUT)
    assert jnp.allclose(latent, lat_ref, atol=5e-2, rtol=5e-2)
    assert jnp.allclose(output, out_ref, atol=5e-2, rtol=5e-2)

    # Larger batch that exercises batch tiling + padding (tb=64, grid=(3,)).
    B2 = 160
    x2 = jax.random.normal(kx, (B2, INP), jnp.float32)
    latent2, output2 = net_forward(x2, w1_p, b1_p, w2_p, b2_p, block_b=64)
    jax.block_until_ready((latent2, output2))
    lat2_ref, out2_ref = ref_forward(x2)
    assert latent2.shape == (B2, HID) and output2.shape == (B2, OUT)
    assert jnp.allclose(latent2, lat2_ref, atol=5e-2, rtol=5e-2)
    assert jnp.allclose(output2, out2_ref, atol=5e-2, rtol=5e-2)

    print("KERNEL_OK")
</pallas_src>

<mosaic_0001>
module attributes {stable_mosaic.version = 11 : i64} {
  func.func @autoencoder_kernel(%arg0: i32, %arg1: memref<8x784xf32, #tpu.memory_space<vmem>>, %arg2: memref<784x128xbf16, #tpu.memory_space<vmem>>, %arg3: memref<1x128xf32, #tpu.memory_space<vmem>>, %arg4: memref<128x784xbf16, #tpu.memory_space<vmem>>, %arg5: memref<1x784xf32, #tpu.memory_space<vmem>>, %arg6: memref<8x100xf32, #tpu.memory_space<vmem>>, %arg7: memref<8x784xf32, #tpu.memory_space<vmem>>) attributes {dimension_semantics = [#tpu.dimension_semantics<parallel>], iteration_bounds = array<i64: 2>, scalar_prefetch = 0 : i64, scratch_operands = 0 : i64, tpu.core_type = #tpu.core_type<tc>, window_params = [{transform_indices = @transform_0, window_bounds = array<i64: 8, 784>}, {pipeline_mode = #tpu.pipeline_mode<synchronous>, transform_indices = @transform_1, window_bounds = array<i64: 784, 128>}, {pipeline_mode = #tpu.pipeline_mode<synchronous>, transform_indices = @transform_2, window_bounds = array<i64: 1, 128>}, {pipeline_mode = #tpu.pipeline_mode<synchronous>, transform_indices = @transform_3, window_bounds = array<i64: 128, 784>}, {pipeline_mode = #tpu.pipeline_mode<synchronous>, transform_indices = @transform_4, window_bounds = array<i64: 1, 784>}, {transform_indices = @transform_5, window_bounds = array<i64: 8, 100>}, {transform_indices = @transform_6, window_bounds = array<i64: 8, 784>}]} {
    %c0 = arith.constant 0 : index
    %c0_0 = arith.constant 0 : index
    %0 = vector.load %arg1[%c0, %c0_0] : memref<8x784xf32, #tpu.memory_space<vmem>>, vector<8x784xf32>
    %1 = arith.truncf %0 : vector<8x784xf32> to vector<8x784xbf16>
    %c0_1 = arith.constant 0 : index
    %c0_2 = arith.constant 0 : index
    %2 = vector.load %arg2[%c0_1, %c0_2] : memref<784x128xbf16, #tpu.memory_space<vmem>>, vector<784x128xbf16>
    %cst = arith.constant dense<0.000000e+00> : vector<8x128xf32>
    %3 = tpu.matmul %1, %2, %cst {dimension_numbers = #tpu.dot_dimension_numbers<[1], [0], [0], [1], [0, 0, 1, 1], [], []>} : vector<8x784xbf16>, vector<784x128xbf16>, vector<8x128xf32> -> vector<8x128xf32>
    %c0_3 = arith.constant 0 : index
    %c0_4 = arith.constant 0 : index
    %4 = vector.load %arg3[%c0_3, %c0_4] : memref<1x128xf32, #tpu.memory_space<vmem>>, vector<1x128xf32>
    %5 = vector.broadcast %4 : vector<1x128xf32> to vector<8x128xf32>
    %6 = arith.addf %3, %5 : vector<8x128xf32>
    %7 = vector.extract_strided_slice %6 {offsets = [0, 0], sizes = [8, 100], strides = [1, 1]} : vector<8x128xf32> to vector<8x100xf32>
    %c0_5 = arith.constant 0 : index
    %c0_6 = arith.constant 0 : index
    %8 = vector.load %arg6[%c0_5, %c0_6] : memref<8x100xf32, #tpu.memory_space<vmem>>, vector<8x100xf32>
    tpu.vector_store %arg6[%c0_5, %c0_6], %7 {strides = array<i32>} : memref<8x100xf32, #tpu.memory_space<vmem>>, vector<8x100xf32>,
    %9 = arith.truncf %6 : vector<8x128xf32> to vector<8x128xbf16>
    %c0_7 = arith.constant 0 : index
    %c0_8 = arith.constant 0 : index
    %10 = vector.load %arg4[%c0_7, %c0_8] : memref<128x784xbf16, #tpu.memory_space<vmem>>, vector<128x784xbf16>
    %cst_9 = arith.constant dense<0.000000e+00> : vector<8x784xf32>
    %11 = tpu.matmul %9, %10, %cst_9 {dimension_numbers = #tpu.dot_dimension_numbers<[1], [0], [0], [1], [0, 0, 1, 1], [], []>} : vector<8x128xbf16>, vector<128x784xbf16>, vector<8x784xf32> -> vector<8x784xf32>
    %c0_10 = arith.constant 0 : index
    %c0_11 = arith.constant 0 : index
    %12 = vector.load %arg5[%c0_10, %c0_11] : memref<1x784xf32, #tpu.memory_space<vmem>>, vector<1x784xf32>
    %13 = vector.broadcast %12 : vector<1x784xf32> to vector<8x784xf32>
    %14 = arith.addf %11, %13 : vector<8x784xf32>
    %c0_12 = arith.constant 0 : index
    %c0_13 = arith.constant 0 : index
    %15 = vector.load %arg7[%c0_12, %c0_13] : memref<8x784xf32, #tpu.memory_space<vmem>>, vector<8x784xf32>
    tpu.vector_store %arg7[%c0_12, %c0_13], %14 {strides = array<i32>} : memref<8x784xf32, #tpu.memory_space<vmem>>, vector<8x784xf32>,
    return
  }
  func.func @transform_0(%arg0: i32) -> (i32, i32) {
    %c0_i32 = arith.constant 0 : i32
    %c0_i32_0 = arith.constant 0 : i32
    return %arg0, %c0_i32 : i32, i32
  }
  func.func @transform_1(%arg0: i32) -> (i32, i32) {
    %c0_i32 = arith.constant 0 : i32
    %c0_i32_0 = arith.constant 0 : i32
    %c0_i32_1 = arith.constant 0 : i32
    return %c0_i32, %c0_i32_0 : i32, i32
  }
  func.func @transform_2(%arg0: i32) -> (i32, i32) {
    %c0_i32 = arith.constant 0 : i32
    %c0_i32_0 = arith.constant 0 : i32
    %c0_i32_1 = arith.constant 0 : i32
    return %c0_i32, %c0_i32_0 : i32, i32
  }
  func.func @transform_3(%arg0: i32) -> (i32, i32) {
    %c0_i32 = arith.constant 0 : i32
    %c0_i32_0 = arith.constant 0 : i32
    %c0_i32_1 = arith.constant 0 : i32
    return %c0_i32, %c0_i32_0 : i32, i32
  }
  func.func @transform_4(%arg0: i32) -> (i32, i32) {
    %c0_i32 = arith.constant 0 : i32
    %c0_i32_0 = arith.constant 0 : i32
    %c0_i32_1 = arith.constant 0 : i32
    return %c0_i32, %c0_i32_0 : i32, i32
  }
  func.func @transform_5(%arg0: i32) -> (i32, i32) {
    %c0_i32 = arith.constant 0 : i32
    %c0_i32_0 = arith.constant 0 : i32
    return %arg0, %c0_i32 : i32, i32
  }
  func.func @transform_6(%arg0: i32) -> (i32, i32) {
    %c0_i32 = arith.constant 0 : i32
    %c0_i32_0 = arith.constant 0 : i32
    return %arg0, %c0_i32 : i32, i32
  }
}

</mosaic_0001>

<bundles_post_ra>
// kernel: net_forward.1
= control target key start
LH: loop header
LB: loop body
LE: loop exit
PB: predicated region body
PF: predicated region fallthrough
CT: control target
= control target key end

     0   :  { %12 = vsyncpa [#allocation3], 0  ;;  %s2539_s0 = inlined_call_operand.vmem [shape: f32[16,784], index: 0, kind: input, shape index: {}]   ;;  %s2540_s1 = inlined_call_operand.vmem [shape: bf16[784,128], index: 1, kind: input, shape index: {}]   ;;  %s2541_s2 = inlined_call_operand.vmem [shape: f32[1,128], index: 2, kind: input, shape index: {}]   ;;  %s2542_s3 = inlined_call_operand.vmem [shape: bf16[128,784], index: 3, kind: input, shape index: {}]   ;;  %s2543_s4 = inlined_call_operand.vmem [shape: f32[1,784], index: 4, kind: input, shape index: {}]   ;;  %s2544_s5 = inlined_call_operand.hbm [shape: f32[16,100], index: 5, kind: output, shape index: {0}]   ;;  %s2545_s6 = inlined_call_operand.hbm [shape: f32[16,784], index: 6, kind: output, shape index: {1}]  }
   0x1   :  { %14 = vsyncpa [#allocation3 + $0x1], 0 }
   0x2   :  { %15 = vsyncpa [#allocation5], 0 }
   0x3   :  { %17 = vsyncpa [#allocation5 + $0x1], 0  ;;  %s2061_s21 = smov 0   ;;  %s2063_s22 = smov 0  }
   0x4   :  { %s2065_s23 = smov 0   ;;  %s2067_s24 = smov 0  }
   0x5 LB: > { %s2082_s25 = sadd.s32 4294967295, %s2019_s24   ;;  %s1525_s26 = sadd.s32 4294967294, %s2019_s24   ;;  %s2019_s24 = sphi %s2067_s24, %s2551_s24   ;;  %s2015_s23 = sphi %s2065_s23, %s2550_s23   ;;  %s2011_s22 = sphi %s2063_s22, %s2549_s22   ;;  %s2007_s21 = sphi %s2061_s21, %s2548_s21  }
   0x6   : > { %s2086_s27 = sadd.s32 1, %s2019_s24   ;;  %s140_s28 = sadd.s32 1, %s2015_s23 }
   0x7   : > { %s137_s29 = ssub.s32 %s2019_s24, %s2086_s27  ;;  %p150_p0 = scmp.ne.s32.totalorder %s2015_s23, %s2011_s22 }
   0x8   : > { %p138_p1 = scmp.eq.s32.totalorder %s137_s29, 0  ;;  %p151_p2 = scmp.eq.s32.totalorder %s2082_s25, 1 }
   0x9   : > { %p156_p3 = scmp.ne.s32.totalorder %s2011_s22, %s2007_s21  ;;  %p157_p4 = scmp.eq.s32.totalorder %s1525_s26, 1 }
   0xa   : > { %s2097_s30 = scalar_select %p138_p1, %s2015_s23, %s140_s28  }
   0xb   : > { %p2099_p5 = por %p151_p2, %p150_p0  ;;  %p2103_p6 = por %p157_p4, %p156_p3 }
   0xc   : > { %p1528_p7 = scmp.ge.s32.totalorder %s2019_s24, 1  ;;  %p221_p8 = scmp.lt.s32.totalorder %s2019_s24, 3 }
   0xe   : > { %p222_p9 = pnand %p1528_p7, %p221_p8 }
   0xf   : > { %v1796_v0 = vld [vmem:[%s2540_s1 + $0x40] sm:$0xff] (!%p222_p9)   ;;  %v1800_v4 = vld [vmem:[%s2540_s1 + $0x48] sm:$0xff] (!%p222_p9)   ;;  %v1804_v8 = vld [vmem:[%s2540_s1 + $0x50] sm:$0xff] (!%p222_p9)   ;;  %p256_p10 = scmp.lt.s32.totalorder (!%p222_p9), %s2082_s25, 1  ;;  %v2021_v44 = vmov (!%p222_p9), 0.0   ;;  %vm2022_vm0 = vmmov (!%p222_p9), 0  }
  0x10   : > { %225 = sbr.rel (%p222_p9) target bundleno = 562 (0x232), region = 40  ;;  %v1797_v1 = vld [vmem:[%s2540_s1] sm:$0xff] (!%p222_p9)   ;;  %1643 = vmatprep.subr.bf16.mxu0 (!%p222_p9), %v1796_v0  ;;  %v1801_v5 = vld [vmem:[%s2540_s1 + $0x8] sm:$0xff] (!%p222_p9)   ;;  %v1805_v9 = vld [vmem:[%s2540_s1 + $0x10] sm:$0xff] (!%p222_p9)   ;;  %vm675_vm1 = vcmask (!%p222_p9), 130048   ;;  %vm839_vm2 = vcmask (!%p222_p9), 818176  }
  0x11   : > { %v1798_v2 = vld [vmem:[%s2540_s1 + $0xc0] sm:$0xff] (!%p222_p9)   ;;  %1644 = vmatpush3.bf16.msra.mxu0 (!%p222_p9), %v1797_v1  ;;  %v1802_v6 = vld [vmem:[%s2540_s1 + $0xc8] sm:$0xff] (!%p222_p9)   ;;  %v1806_v10 = vld [vmem:[%s2540_s1 + $0xd0] sm:$0xff] (!%p222_p9)   ;;  %s1639_s13 = sshll.u32 (!%p222_p9), %s2082_s25, 7  ;;  %s2024_s20 = smov (!%p222_p9), [#allocation2]  }
  0x12   : > { %v1799_v3 = vld [vmem:[%s2540_s1 + $0x80] sm:$0xff] (!%p222_p9)   ;;  %1665 = vmatprep.subr.bf16.mxu1 (!%p222_p9), %v1798_v2  ;;  %1645 = vmatprep.subr.bf16.mxu0 (!%p222_p9), %v1800_v4  ;;  %v1803_v7 = vld [vmem:[%s2540_s1 + $0x88] sm:$0xff] (!%p222_p9)   ;;  %v1807_v11 = vld [vmem:[%s2540_s1 + $0x90] sm:$0xff] (!%p222_p9)   ;;  %s2467_s17 = scalar_lea.hbm (!%p222_p9), %s2544_s5, %s1639_s13  ;;  %s1929_s28 = sshll.u32 (!%p222_p9), %s2024_s20, 4  ;;  %s1930_s28 = int_to_ptr.vmem [resolvable:$false] %s1929_s28 }
  0x13   : > { %1666 = vmatpush3.bf16.msra.mxu1 (!%p222_p9), %v1799_v3  ;;  %v1808_v12 = vld [vmem:[%s2540_s1 + $0x58] sm:$0xff] (!%p222_p9)   ;;  %v1812_v16 = vld [vmem:[%s2540_s1 + $0x60] sm:$0xff] (!%p222_p9)   ;;  %v1816_v20 = vld [vmem:[%s2540_s1 + $0x68] sm:$0xff] (!%p222_p9)   ;;  %s1931_s29 = scalar_lea.vmem (!%p222_p9), %s1930_s28, 256 }
  0x14   : > { %1667 = vmatprep.subr.bf16.mxu1 (!%p222_p9), %v1802_v6  ;;  %v1809_v13 = vld [vmem:[%s2540_s1 + $0x18] sm:$0xff] (!%p222_p9)   ;;  %v1813_v17 = vld [vmem:[%s2540_s1 + $0x20] sm:$0xff] (!%p222_p9)   ;;  %v1817_v21 = vld [vmem:[%s2540_s1 + $0x28] sm:$0xff] (!%p222_p9)  }
  0x15   : > { %1646 = vmatpush3.bf16.msra.mxu0 (!%p222_p9), %v1801_v5  ;;  %v1810_v14 = vld [vmem:[%s2540_s1 + $0xd8] sm:$0xff] (!%p222_p9)   ;;  %v1814_v18 = vld [vmem:[%s2540_s1 + $0xe0] sm:$0xff] (!%p222_p9)   ;;  %v1818_v22 = vld [vmem:[%s2540_s1 + $0xe8] sm:$0xff] (!%p222_p9)  }
  0x16   : > { %1647 = vmatprep.subr.bf16.mxu0 (!%p222_p9), %v1804_v8  ;;  %v1811_v15 = vld [vmem:[%s2540_s1 + $0x98] sm:$0xff] (!%p222_p9)   ;;  %v1815_v19 = vld [vmem:[%s2540_s1 + $0xa0] sm:$0xff] (!%p222_p9)   ;;  %v1819_v23 = vld [vmem:[%s2540_s1 + $0xa8] sm:$0xff] (!%p222_p9)  }
  0x17   : > { %1668 = vmatpush3.bf16.msra.mxu1 %v1803_v7  ;;  %s257_s26 = scalar_select %p256_p10, %s2082_s25, 1  ;;  %v1820_v24 = vld [vmem:[%s2540_s1 + $0x70] sm:$0xff]   ;;  %v1824_v28 = vld [vmem:[%s2540_s1 + $0x78] sm:$0xff]   ;;  %v1828_v36 = vld [vmem:[%s2540_s1 + $0x140] sm:$0xff]  }
  0x18   : > { %1669 = vmatprep.subr.bf16.mxu1 %v1806_v10  ;;  %v1821_v25 = vld [vmem:[%s2540_s1 + $0x30] sm:$0xff]   ;;  %v1825_v29 = vld [vmem:[%s2540_s1 + $0x38] sm:$0xff]   ;;  %v1829_v39 = vld [vmem:[%s2540_s1 + $0x100] sm:$0xff]  }
  0x19   : > { %1648 = vmatpush3.bf16.msra.mxu0 %v1805_v9  ;;  %s1747_s15 = smul.u32 56, %s257_s26  ;;  %v1822_v26 = vld [vmem:[%s2540_s1 + $0xf0] sm:$0xff]   ;;  %v1826_v30 = vld [vmem:[%s2540_s1 + $0xf8] sm:$0xff]   ;;  %v1830_v42 = vld [vmem:[%s2540_s1 + $0x148] sm:$0xff]  }
  0x1a   : > { %1649 = vmatprep.subr.bf16.mxu0 %v1808_v12  ;;  %v1823_v27 = vld [vmem:[%s2540_s1 + $0xb0] sm:$0xff]   ;;  %v1827_v33 = vld [vmem:[%s2540_s1 + $0xb8] sm:$0xff]   ;;  %v1831_v43 = vld [vmem:[%s2540_s1 + $0x108] sm:$0xff]  }
  0x1b   : > { %1670 = vmatpush3.bf16.msra.mxu1 %v1807_v11  ;;  %s2201_s11 = scalar_lea.vmem %s2539_s0, %s1747_s15  ;;  %v1832_v45 = vld [vmem:[%s2540_s1 + $0x150] sm:$0xff]   ;;  %v1834_v47 = vld [vmem:[%s2540_s1 + $0x158] sm:$0xff]   ;;  %v1836_v49 = vld [vmem:[%s2540_s1 + $0x160] sm:$0xff]  }
  0x1c   : > { %1671 = vmatprep.subr.bf16.mxu1 %v1810_v14  ;;  %v263_v31 = vld [vmem:[%s2201_s11 + $0x8] sm:$0xff]  ;;  %v262_v34 = vld [vmem:[%s2201_s11] sm:$0xff]  ;;  %v265_v37 = vld [vmem:[%s2201_s11 + $0x18] sm:$0xff] }
  0x1d   : > { %1650 = vmatpush3.bf16.msra.mxu0 %v1809_v13  ;;  %v270_v32 = vpack.c.bf16 %v263_v31, %v263_v31  ;;  %v269_v35 = vpack.c.bf16 %v262_v34, %v262_v34  ;;  %v272_v38 = vpack.c.bf16 %v265_v37, %v265_v37  ;;  %v264_v40 = vld [vmem:[%s2201_s11 + $0x10] sm:$0xff]  ;;  %v1835_v48 = vld [vmem:[%s2540_s1 + $0x118] sm:$0xff]   ;;  %v1837_v50 = vld [vmem:[%s2540_s1 + $0x120] sm:$0xff]  }
  0x1e   : > { %1651 = vmatprep.subr.bf16.mxu0 %v1812_v16  ;;  %v271_v41 = vpack.c.bf16 %v264_v40, %v264_v40  ;;  %v1833_v46 = vld [vmem:[%s2540_s1 + $0x110] sm:$0xff]   ;;  %v1838_v51 = vld [vmem:[%s2540_s1 + $0x168] sm:$0xff]   ;;  %v1844_v53 = vld [vmem:[%s2540_s1 + $0x180] sm:$0xff]  }
  0x1f   : > { %1672 = vmatpush3.bf16.msra.mxu1 %v1811_v15  ;;  %711 = vmatprep.mubr.bf16.mxu0 %v270_v32  ;;  %v1839_v52 = vld [vmem:[%s2540_s1 + $0x128] sm:$0xff]   ;;  %v1840_v55 = vld [vmem:[%s2540_s1 + $0x170] sm:$0xff]   ;;  %v1842_v60 = vld [vmem:[%s2540_s1 + $0x178] sm:$0xff]  }
  0x20   : > { %1673 = vmatprep.subr.bf16.mxu1 %v1814_v18  ;;  %751 = vmatprep.mubr.bf16.mxu1 %v272_v38  ;;  %v267_v54 = vld [vmem:[%s2201_s11 + $0x28] sm:$0xff]  ;;  %v268_v57 = vld [vmem:[%s2201_s11 + $0x30] sm:$0xff]  ;;  %v1843_v61 = vld [vmem:[%s2540_s1 + $0x138] sm:$0xff]  }
  0x21   : > { %1652 = vmatpush3.bf16.msra.mxu0 %v1813_v17  ;;  %v274_v56 = vpack.c.bf16 %v267_v54, %v267_v54  ;;  %v275_v58 = vpack.c.bf16 %v268_v57, %v268_v57  ;;  %v1841_v59 = vld [vmem:[%s2540_s1 + $0x130] sm:$0xff]   ;;  %v266_v62 = vld [vmem:[%s2201_s11 + $0x20] sm:$0xff]  ;;  %v1850_v3 = vld [vmem:[%s2542_s3 + $0xc] ss:$28 sps:$4 sm:$0xff]   ;;  %s2378_s11 = sand.u32 1, %s2011_s22  }
  0x22   : > { %1653 = vmatprep.subr.bf16.mxu0 %v1816_v20  ;;  %v273_v63 = vpack.c.bf16 %v266_v62, %v266_v62  ;;  %v1845_v0 = vld [vmem:[%s2542_s3] ss:$28 sps:$4 sm:$0xff]   ;;  %v1848_v2 = vld [vmem:[%s2542_s3 + $0x8] ss:$28 sps:$4 sm:$0xff]   ;;  %v1851_v6 = vld [vmem:[%s2542_s3 + $0x38] ss:$28 sps:$4 sm:$0xff]  }
  0x23   : > { %1674 = vmatpush3.bf16.msra.mxu1 %v1815_v19  ;;  %v1847_v1 = vld [vmem:[%s2542_s3 + $0x4] ss:$28 sps:$4 sm:$0xff]   ;;  %v1853_v4 = vld [vmem:[%s2542_s3 + $0x3c] ss:$28 sps:$4 sm:$0xff]   ;;  %v1859_v8 = vld [vmem:[%s2542_s3 + $0x74] ss:$28 sps:$4 sm:$0xff]  }
  0x24   : > { %1675 = vmatprep.subr.bf16.mxu1 %v1818_v22  ;;  %v1856_v5 = vld [vmem:[%s2542_s3 + $0x44] ss:$28 sps:$4 sm:$0xff]   ;;  %v1862_v9 = vld [vmem:[%s2542_s3 + $0x7c] ss:$28 sps:$4 sm:$0xff]   ;;  %v1857_v10 = vld [vmem:[%s2542_s3 + $0x70] ss:$28 sps:$4 sm:$0xff]  }
  0x25   : > { %1654 = vmatpush3.bf16.msra.mxu0 %v1817_v21  ;;  %v1854_v7 = vld [vmem:[%s2542_s3 + $0x40] ss:$28 sps:$4 sm:$0xff]   ;;  %v1860_v11 = vld [vmem:[%s2542_s3 + $0x78] ss:$28 sps:$4 sm:$0xff]   ;;  %v1865_v12 = vld [vmem:[%s2542_s3 + $0xac] ss:$28 sps:$4 sm:$0xff]  }
  0x26   : > { %1655 = vmatprep.subr.bf16.mxu0 %v1820_v24  ;;  %v1868_v13 = vld [vmem:[%s2542_s3 + $0xb4] ss:$28 sps:$4 sm:$0xff]   ;;  %v1863_v14 = vld [vmem:[%s2542_s3 + $0xa8] ss:$28 sps:$4 sm:$0xff]   ;;  %v1869_v18 = vld [vmem:[%s2542_s3 + $0xe0] ss:$28 sps:$4 sm:$0xff]  }
  0x27   : > { %1676 = vmatpush3.bf16.msra.mxu1 %v1819_v23  ;;  %v1866_v15 = vld [vmem:[%s2542_s3 + $0xb0] ss:$28 sps:$4 sm:$0xff]   ;;  %v1871_v16 = vld [vmem:[%s2542_s3 + $0xe4] ss:$28 sps:$4 sm:$0xff]   ;;  %v1877_v20 = vld [vmem:[%s2542_s3 + $0x11c] ss:$28 sps:$4 sm:$0xff]  }
  0x28   : > { %1677 = vmatprep.subr.bf16.mxu1 %v1822_v26  ;;  %v1874_v17 = vld [vmem:[%s2542_s3 + $0xec] ss:$28 sps:$4 sm:$0xff]   ;;  %v1880_v21 = vld [vmem:[%s2542_s3 + $0x124] ss:$28 sps:$4 sm:$0xff]   ;;  %v1875_v22 = vld [vmem:[%s2542_s3 + $0x118] ss:$28 sps:$4 sm:$0xff]  }
  0x29   : > { %1656 = vmatpush3.bf16.msra.mxu0 %v1821_v25  ;;  %v1872_v19 = vld [vmem:[%s2542_s3 + $0xe8] ss:$28 sps:$4 sm:$0xff]   ;;  %v1878_v23 = vld [vmem:[%s2542_s3 + $0x120] ss:$28 sps:$4 sm:$0xff]   ;;  %v1883_v24 = vld [vmem:[%s2542_s3 + $0x154] ss:$28 sps:$4 sm:$0xff]  }
  0x2a   : > { %1657 = vmatprep.subr.bf16.mxu0 %v1824_v28  ;;  %v1886_v25 = vld [vmem:[%s2542_s3 + $0x15c] ss:$28 sps:$4 sm:$0xff]   ;;  %v1881_v26 = vld [vmem:[%s2542_s3 + $0x150] ss:$28 sps:$4 sm:$0xff]   ;;  %s1529_s18 = sshll.u32 %s2378_s11, 3 }
  0x2b   : > { %1678 = vmatpush3.bf16.msra.mxu1 %v1823_v27  ;;  %v1884_v27 = vld [vmem:[%s2542_s3 + $0x158] ss:$28 sps:$4 sm:$0xff]   ;;  %v1889_v28 = vld [vmem:[%s2542_s3 + $0x18c] ss:$28 sps:$4 sm:$0xff]   ;;  %s2390_s10 = scalar_lea.vmem [#allocation2], %s1529_s18  ;;  %s1402_s18 = scalar_lea.sflag [#allocation3], %s2378_s11 }
  0x2c   : > { %1679 = vmatprep.subr.bf16.mxu1 %v1826_v30  ;;  %v1887_v30 = vld [vmem:[%s2542_s3 + $0x188] ss:$28 sps:$4 sm:$0xff]   ;;  %v1890_v31 = vld [vmem:[%s2542_s3 + $0x190] ss:$28 sps:$4 sm:$0xff]   ;;  %s1420_s14 = sshll.u32 %s2390_s10, 4  ;;  %s1421_s14 = int_to_ptr.vmem [resolvable:$true] %s1420_s14 }
  0x2d   : > { %1658 = vmatpush3.bf16.msra.mxu0 %v1825_v29  ;;  %v1892_v29 = vld [vmem:[%s2542_s3 + $0x194] ss:$28 sps:$4 sm:$0xff]   ;;  %v1899_v62 = vld [vmem:[%s2542_s3 + $0x4c] ss:$28 sps:$4 sm:$0xff]   ;;  %s1925_s19 = scalar_lea.vmem %s1421_s14, 128  ;;  %p1932_p0 = scmp.lt.s32.totalorder %s1421_s14, %s1930_s28 }
  0x2e   : > { %1687 = vmatprep.subr.bf16.mxu0 %v1828_v36  ;;  %v1895_v32 = vld [vmem:[%s2542_s3 + $0x14] ss:$28 sps:$4 sm:$0xff]   ;;  %p1926_p11 = scmp.ne.s32.totalorder %s1421_s14, %s1925_s19  ;;  %p1933_p1 = scmp.lt.s32.totalorder %s1931_s29, %s1925_s19 }
  0x2f   : > { %1680 = vmatpush3.bf16.msra.mxu1 %v1827_v33  ;;  %v2023_v33 = vmov 0  }
  0x30   : > { %712 = vmatmul.mubr.bf16.vlgmr.msra.gmra.mrb[0].mxu0 %v269_v35  ;;  %1720 = vmatprep.subr.bf16.mxu1 %v2021_v44  ;;  %v1531_v35 = vld [vmem:[%s2541_s2] ss:$0 sm:$0xff]  ;;  %p1927_p12 = pnand %p1926_p11, %p2099_p5  ;;  %p1934_p2 = por %p1933_p1, %p1932_p0 }
  0x31   : > { %1688 = vmatpush3.bf16.msra.mxu0 %v1829_v39  ;;  %791 = vmatprep.mubr.bf16.mxu0 %v274_v56 }
  0x32   : > { %752 = vmatmul.mubr.bf16.vlgmr.msra.gmra.mrb[0].mxu1 %v271_v41  ;;  %1689 = vmatprep.subr.bf16.mxu0 %v1830_v42  ;;  %p1928_p13 = pneg %p1927_p12 }
  0x33   : > { %1722 = vmatprep.mubr.msk.bf16.mxu1 %vm2022_vm0, %v2021_v44  ;;  %1721 = vmatpush3.bf16.msra.mxu1 %v1844_v53 }
  0x34   : > { %1231 = vmatprep.subr.bf16.mxu1 %v1847_v1  ;;  %v1903_v1 = vld [vmem:[%s2542_s3 + $0x84] ss:$28 sps:$4 sm:$0xff]   ;;  %p1935_p3 = pnand %p1934_p2, %p1928_p13 }
  0x35   : > { %1690 = vmatpush3.bf16.msra.mxu0 %v1831_v43 }
  0x36   : > { %1691 = vmatprep.subr.bf16.mxu0 %v1832_v45 }
  0x39   : > { %1692 = vmatpush3.bf16.msra.mxu0 %v1833_v46 }
  0x3a   : > { %1693 = vmatprep.subr.bf16.mxu0 %v1834_v47  ;;  %1723 = vmatmul.mubr.msk.bf16.vlgmr.msra.gmra.mrb[4].mxu1 %vm675_vm1, %v275_v58 }
  0x3b   : > { %1232 = vmatpush1.bf16.msra.mxu1 %v1845_v0  ;;  %1263 = vmatprep.mubr.bf16.mxu1 %v2023_v33  ;;  %v1900_v0 = vld [vmem:[%s2542_s3 + $0x50] ss:$28 sps:$4 sm:$0xff]  }
  0x3c   : > { %1233 = vmatprep.subr.bf16.mxu1 %v1853_v4  ;;  %v1907_v4 = vld [vmem:[%s2542_s3 + $0xbc] ss:$28 sps:$4 sm:$0xff]  }
  0x3d   : > { %1694 = vmatpush3.bf16.msra.mxu0 %v1835_v48 }
  0x3e   : > { %1695 = vmatprep.subr.bf16.mxu0 %v1836_v49 }
  0x3f   : > { %1234 = vmatpush1.bf16.msra.mxu1 %v1851_v6  ;;  %v1908_v6 = vld [vmem:[%s2542_s3 + $0xc0] ss:$28 sps:$4 sm:$0xff]  }
  0x40   : > { %1235 = vmatprep.subr.bf16.mxu1 %v1859_v8  ;;  %v1909_v8 = vld [vmem:[%s2542_s3 + $0xf0] ss:$28 sps:$4 sm:$0xff]  }
  0x41   : > { %1696 = vmatpush3.bf16.msra.mxu0 %v1837_v50 }
  0x42   : > { %1697 = vmatprep.subr.bf16.mxu0 %v1838_v51 }
  0x43   : > { %1236 = vmatpush1.bf16.msra.mxu1 %v1857_v10  ;;  %v1915_v10 = vld [vmem:[%s2542_s3 + $0x12c] ss:$28 sps:$4 sm:$0xff]  }
  0x44   : > { %1237 = vmatprep.subr.bf16.mxu1 %v1865_v12  ;;  %v1916_v12 = vld [vmem:[%s2542_s3 + $0x130] ss:$28 sps:$4 sm:$0xff]  }
  0x45   : > { %1698 = vmatpush3.bf16.msra.mxu0 %v1839_v52 }
  0x46   : > { %1699 = vmatprep.subr.bf16.mxu0 %v1840_v55 }
  0x47   : > { %1238 = vmatpush1.bf16.msra.mxu1 %v1863_v14  ;;  %v1917_v14 = vld [vmem:[%s2542_s3 + $0x160] ss:$28 sps:$4 sm:$0xff]  }
  0x48   : > { %1239 = vmatprep.subr.bf16.mxu1 %v1871_v16  ;;  %v1923_v16 = vld [vmem:[%s2542_s3 + $0x19c] ss:$28 sps:$4 sm:$0xff]  }
  0x49   : > { %1700 = vmatpush3.bf16.msra.mxu0 %v1841_v59  ;;  %v1893_v59 = vld [vmem:[%s2542_s3 + $0x10] ss:$28 sps:$4 sm:$0xff]  }
  0x4a   : > { %1701 = vmatprep.subr.bf16.mxu0 %v1842_v60  ;;  %v1896_v60 = vld [vmem:[%s2542_s3 + $0x18] ss:$28 sps:$4 sm:$0xff]  }
  0x4b   : > { %1240 = vmatpush1.bf16.msra.mxu1 %v1869_v18  ;;  %v1924_v18 = vld [vmem:[%s2542_s3 + $0x1a0] ss:$28 sps:$4 sm:$0xff]  }
  0x4c   : > { %1241 = vmatprep.subr.bf16.mxu1 %v1877_v20 }
  0x4d   : > { %1702 = vmatpush3.bf16.msra.mxu0 %v1843_v61 }
  0x4e   : > { %1272 = vmatprep.subr.bf16.mxu0 %v1850_v3  ;;  %v1904_v3 = vld [vmem:[%s2542_s3 + $0x88] ss:$28 sps:$4 sm:$0xff]  }
  0x4f   : > { %1242 = vmatpush1.bf16.msra.mxu1 %v1875_v22 }
  0x50   : > { %792 = vmatmul.mubr.bf16.vlgmr.msra.gmra.mrb[4].mxu0 %v273_v63  ;;  %1243 = vmatprep.subr.bf16.mxu1 %v1883_v24  ;;  %v1897_v63 = vld [vmem:[%s2542_s3 + $0x48] ss:$28 sps:$4 sm:$0xff]  }
  0x51   : > { %1273 = vmatpush1.bf16.msra.mxu0 %v1848_v2  ;;  %1304 = vmatprep.mubr.bf16.mxu0 %v2023_v33  ;;  %v1901_v2 = vld [vmem:[%s2542_s3 + $0x80] ss:$28 sps:$4 sm:$0xff]  }
  0x52   : > { %1274 = vmatprep.subr.bf16.mxu0 %v1856_v5  ;;  %v1905_v5 = vld [vmem:[%s2542_s3 + $0xb8] ss:$28 sps:$4 sm:$0xff]  }
  0x53   : > { %1244 = vmatpush1.bf16.msra.mxu1 %v1881_v26 }
  0x54   : > { %1245 = vmatprep.subr.bf16.mxu1 %v1889_v28 }
  0x55   : > { %1275 = vmatpush1.bf16.msra.mxu0 %v1854_v7  ;;  %v1911_v7 = vld [vmem:[%s2542_s3 + $0xf4] ss:$28 sps:$4 sm:$0xff]  }
  0x56   : > { %1276 = vmatprep.subr.bf16.mxu0 %v1862_v9  ;;  %v1912_v9 = vld [vmem:[%s2542_s3 + $0xf8] ss:$28 sps:$4 sm:$0xff]  }
  0x57   : > { %1246 = vmatpush1.bf16.msra.mxu1 %v1887_v30 }
  0x58   : > { %1313 = vmatprep.subr.bf16.mxu1 %v1895_v32 }
  0x59   : > { %1277 = vmatpush1.bf16.msra.mxu0 %v1860_v11  ;;  %v1913_v11 = vld [vmem:[%s2542_s3 + $0x128] ss:$28 sps:$4 sm:$0xff]  }
  0x5a   : > { %1278 = vmatprep.subr.bf16.mxu0 %v1868_v13  ;;  %v1919_v13 = vld [vmem:[%s2542_s3 + $0x164] ss:$28 sps:$4 sm:$0xff]  }
  0x5d   : > { %1279 = vmatpush1.bf16.msra.mxu0 %v1866_v15  ;;  %v1920_v15 = vld [vmem:[%s2542_s3 + $0x168] ss:$28 sps:$4 sm:$0xff]  }
  0x5e   : > { %1280 = vmatprep.subr.bf16.mxu0 %v1874_v17  ;;  %v1921_v17 = vld [vmem:[%s2542_s3 + $0x198] ss:$28 sps:$4 sm:$0xff]  }
  0x61   : > { %1281 = vmatpush1.bf16.msra.mxu0 %v1872_v19 }
  0x62   : > { %1282 = vmatprep.subr.bf16.mxu0 %v1880_v21 }
  0x65   : > { %1283 = vmatpush1.bf16.msra.mxu0 %v1878_v23 }
  0x66   : > { %1284 = vmatprep.subr.bf16.mxu0 %v1886_v25 }
  0x69   : > { %1285 = vmatpush1.bf16.msra.mxu0 %v1884_v27 }
  0x6a   : > { %1286 = vmatprep.subr.bf16.mxu0 %v1892_v29 }
  0x6d   : > { %1287 = vmatpush1.bf16.msra.mxu0 %v1890_v31 }
  0x6e   : > { %1726 = vmatprep.subr.bf16.mxu0 %v2021_v44 }
 0x103   : > { %v1659_v34 = vpop.f32.mrb[0].mxu0 }
 0x104   : > { %v1660_v36 = vpop.f32.mrb[1].mxu0 }
 0x105   : > { %v1661_v37 = vadd.f32 %v1660_v36, %v1659_v34  ;;  %v1662_v38 = vpop.f32.mrb[2].mxu0  ;;  %v1681_v39 = vpop.f32.mrb[0].mxu1 }
 0x106   : > { %v1663_v40 = vpop.f32.mrb[3].mxu0  ;;  %v1682_v42 = vpop.f32.mrb[1].mxu1 }
 0x107   : > { %v714_v41 = vadd.f32 %v1661_v37, %v1531_v35  ;;  %v1683_v43 = vadd.f32 %v1682_v42, %v1681_v39  ;;  %v1684_v45 = vpop.f32.mrb[2].mxu1 }
 0x108   : > { %v1685_v46 = vpop.f32.mrb[3].mxu1 }
 0x109   : > { %v754_v47 = vadd.f32 %v1683_v43, %v714_v41 }
 0x10d   : > { %v833_v48 = vpop.f32.mrb[4].mxu1 }
 0x10e   : > { %v1724_v49 = vpop.f32.mrb[5].mxu1 }
 0x10f   : > { %v836_v50 = vpop.f32.mrb[6].mxu1 }
 0x110   : > { %v1725_v51 = vpop.f32.mrb[7].mxu1 }
 0x123   : > { %v1703_v52 = vpop.f32.mrb[4].mxu0 }
 0x124   : > { %v1704_v53 = vpop.f32.mrb[5].mxu0 }
 0x125   : > { %v1705_v54 = vadd.f32 %v1704_v53, %v1703_v52  ;;  %v1706_v55 = vpop.f32.mrb[6].mxu0 }
 0x126   : > { %v1707_v56 = vpop.f32.mrb[7].mxu0 }
 0x127   : > { %v794_v57 = vadd.f32 %v1705_v54, %v754_v47 }
 0x129   : > { %v834_v58 = vadd.f32 %v833_v48, %v794_v57 }
 0x12b   : > { %v841_v61 = vpack.c.bf16 %v834_v58, %v834_v58  ;;  %840 = vst.msk [vmem:[%s2390_s10] sm:$0xff] %vm839_vm2, %v834_v58 }
 0x12d   : > { %1264 = vmatmul.mubr.bf16.vlgmr.msra.gmra.mrb[8].mxu1 %v841_v61  ;;  %1305 = vmatmul.mubr.bf16.vlgmr.msra.gmra.mrb[8].mxu0 %v841_v61 }
 0x12e   : > { %1314 = vmatpush1.bf16.msra.mxu1 %v1893_v59  ;;  %1727 = vmatpush3.bf16.msra.mxu0 %v1896_v60 }
 0x12f   : > { %1315 = vmatprep.subr.bf16.mxu1 %v1899_v62  ;;  %1728 = vmatprep.subr.bf16.mxu0 %v2021_v44 }
 0x130   : > { %1345 = vmatprep.mubr.bf16.mxu1 %v2023_v33  ;;  %1742 = vmatprep.mubr.msk.bf16.mxu0 %vm2022_vm0, %v2021_v44 }
 0x132   : > { %1316 = vmatpush1.bf16.msra.mxu1 %v1897_v63  ;;  %1729 = vmatpush3.bf16.msra.mxu0 %v1900_v0 }
 0x133   : > { %1317 = vmatprep.subr.bf16.mxu1 %v1903_v1  ;;  %1730 = vmatprep.subr.bf16.mxu0 %v2021_v44 }
 0x136   : > { %1318 = vmatpush1.bf16.msra.mxu1 %v1901_v2  ;;  %1731 = vmatpush3.bf16.msra.mxu0 %v1904_v3 }
 0x137   : > { %1319 = vmatprep.subr.bf16.mxu1 %v1907_v4  ;;  %1732 = vmatprep.subr.bf16.mxu0 %v2021_v44 }
 0x13a   : > { %1320 = vmatpush1.bf16.msra.mxu1 %v1905_v5  ;;  %1733 = vmatpush3.bf16.msra.mxu0 %v1908_v6 }
 0x13b   : > { %1321 = vmatprep.subr.bf16.mxu1 %v1911_v7  ;;  %1734 = vmatprep.subr.bf16.mxu0 %v2021_v44 }
 0x13e   : > { %1322 = vmatpush1.bf16.msra.mxu1 %v1909_v8  ;;  %1735 = vmatpush3.bf16.msra.mxu0 %v1912_v9 }
 0x13f   : > { %1323 = vmatprep.subr.bf16.mxu1 %v1915_v10  ;;  %1736 = vmatprep.subr.bf16.mxu0 %v2021_v44 }
 0x142   : > { %1324 = vmatpush1.bf16.msra.mxu1 %v1913_v11  ;;  %1737 = vmatpush3.bf16.msra.mxu0 %v1916_v12 }
 0x143   : > { %1325 = vmatprep.subr.bf16.mxu1 %v1919_v13  ;;  %1738 = vmatprep.subr.bf16.mxu0 %v2021_v44 }
 0x146   : > { %1326 = vmatpush1.bf16.msra.mxu1 %v1917_v14  ;;  %1739 = vmatpush3.bf16.msra.mxu0 %v1920_v15 }
 0x147   : > { %1327 = vmatprep.subr.bf16.mxu1 %v1923_v16  ;;  %1740 = vmatprep.subr.bf16.mxu0 %v2021_v44 }
 0x14a   : > { %1328 = vmatpush1.bf16.msra.mxu1 %v1921_v17  ;;  %1741 = vmatpush3.bf16.msra.mxu0 %v1924_v18 }
 0x14d   : > { %1346 = vmatmul.mubr.bf16.vlgmr.msra.gmra.mrb[12].mxu1 %v841_v61  ;;  %1743 = vmatmul.mubr.bf16.vlgmr.msra.gmra.mrb[12].mxu0 %v841_v61 }
 0x14e   : > { %1938 = shalt.err (!%p1935_p3)
}
 0x14f   : > { %s1939_s10 = scalar_lea.hbm %s2467_s17, 128  ;;  %s1943_s12 = scalar_lea.hbm %s2544_s5, 256 }
 0x150   : > { %p1940_p4 = scmp.ne.s32.totalorder %s2467_s17, %s1939_s10  ;;  %p1944_p9 = scmp.lt.u32.totalorder %s2467_s17, %s2544_s5 }
 0x151   : > { %p1945_p10 = scmp.lt.u32.totalorder %s1943_s12, %s1939_s10  ;;  %p1947_p12 = scmp.lt.u32.totalorder %s1939_s10, %s2467_s17 }
 0x152   : > { %p1941_p7 = pnand %p1940_p4, %p2099_p5 }
 0x153   : > { %p1946_p11 = por %p1945_p10, %p1944_p9 }
 0x154   : > { %p1942_p8 = pneg %p1941_p7 }
 0x155   : > { %p1948_p13 = por %p1947_p12, %p1946_p11 }
 0x157   : > { %p1949_p0 = pnand %p1948_p13, %p1942_p8 }
 0x159   : > { %1952 = shalt.err (!%p1949_p0)
}
 0x15a   : > { %1749 = dma.vmem_to_hbm [thread:$0]  (%p2099_p5), %s1421_s14, 128, %s2467_s17, %s1402_s18   ;;  %v908_v44 = vlaneseq  ;;  %v906_v22 = vld [vmem:[%s2543_s4] sm:$0x7f] }
 0x15b   : > { %s1746_s20 = smul.u32 56, %s2378_s11  ;;  %s2025_s26 = smov [#allocation4]  }
 0x15c   : > { %v909_v19 = vshrl.u32 %v908_v44, 7  ;;  %s1748_s17 = smul.u32 896, %s2082_s25  ;;  %s1407_s25 = scalar_lea.sflag [#allocation5], %s2378_s11 }
 0x15d   : > { %s255_s14 = scalar_lea.vmem [#allocation4], %s1746_s20  ;;  %s1957_s12 = sshll.u32 %s2025_s26, 4  ;;  %s1958_s12 = int_to_ptr.vmem [resolvable:$false] %s1957_s12 }
 0x15e   : > { %v910_v20 = vsub.s32 0, %v909_v19  ;;  %v918_v21 = vsub.s32 2, %v909_v19  ;;  %v914_v23 = vsub.s32 1, %v909_v19  ;;  %v922_v24 = vsub.s32 3, %v909_v19  ;;  %s1434_s18 = sshll.u32 %s255_s14, 4  ;;  %s2495_s10 = scalar_lea.hbm %s2545_s6, %s1748_s17  ;;  %s2497_s18 = int_to_ptr.vmem [resolvable:$true] %s1434_s18 }
 0x15f   : > { %v926_v41 = vsub.s32 4, %v909_v19  ;;  %v934_v42 = vsub.s32 6, %v909_v19  ;;  %v930_v43 = vsub.s32 5, %v909_v19  ;;  %s1953_s9 = scalar_lea.vmem %s2497_s18, 896  ;;  %s1959_s13 = scalar_lea.vmem %s1958_s12, 1792 }
 0x160   : > { %v911_v25 = vrot.slane %v906_v22, %v910_v20  ;;  %v919_v26 = vrot.slane %v906_v22, %v918_v21  ;;  %v915_v27 = vrot.slane %v906_v22, %v914_v23  ;;  %v923_v28 = vrot.slane %v906_v22, %v922_v24  ;;  %p1954_p1 = scmp.ne.s32.totalorder %s2497_s18, %s1953_s9  ;;  %p1960_p4 = scmp.lt.s32.totalorder %s2497_s18, %s1958_s12 }
 0x161   : > { %v927_v45 = vrot.slane %v906_v22, %v926_v41  ;;  %v935_v46 = vrot.slane %v906_v22, %v934_v42  ;;  %v931_v47 = vrot.slane %v906_v22, %v930_v43  ;;  %p1961_p7 = scmp.lt.s32.totalorder %s1959_s13, %s1953_s9 }
 0x162   : > { %p1955_p2 = pnand %p1954_p1, %p2099_p5 }
 0x163   : > { %p1962_p8 = por %p1961_p7, %p1960_p4 }
 0x164   : > { %p1956_p3 = pneg %p1955_p2 }
 0x166   : > { %p1963_p9 = pnand %p1962_p8, %p1956_p3 }
 0x200   : > { %v1265_v29 = vpop.f32.mrb[8].mxu1  ;;  %v1306_v30 = vpop.f32.mrb[8].mxu0 }
 0x201   : > { %v1266_v31 = vadd.f32 %v1265_v29, %v911_v25  ;;  %v1307_v32 = vadd.f32 %v1306_v30, %v919_v26  ;;  %v1267_v33 = vpop.f32.mrb[9].mxu1  ;;  %v1308_v34 = vpop.f32.mrb[9].mxu0 }
 0x202   : > { %v1268_v35 = vadd.f32 %v1267_v33, %v915_v27  ;;  %v1309_v36 = vadd.f32 %v1308_v34, %v923_v28  ;;  %v1269_v37 = vpop.f32.mrb[10].mxu1  ;;  %v1310_v38 = vpop.f32.mrb[10].mxu0 }
 0x203   : > { %1394 = vst [vmem:[%s255_s14] sm:$0xff] %v1266_v31  ;;  %1396 = vst [vmem:[%s255_s14 + $0x10] sm:$0xff] %v1307_v32  ;;  %v1270_v39 = vpop.f32.mrb[11].mxu1  ;;  %v1311_v40 = vpop.f32.mrb[11].mxu0 }
 0x204   : > { %1395 = vst [vmem:[%s255_s14 + $0x8] sm:$0xff] %v1268_v35  ;;  %1397 = vst [vmem:[%s255_s14 + $0x18] sm:$0xff] %v1309_v36 }
 0x220   : > { %v1347_v48 = vpop.f32.mrb[12].mxu1  ;;  %v1388_v49 = vpop.f32.mrb[12].mxu0 }
 0x221   : > { %v1348_v50 = vadd.f32 %v1347_v48, %v927_v45  ;;  %v1389_v51 = vadd.f32 %v1388_v49, %v935_v46  ;;  %v1349_v52 = vpop.f32.mrb[13].mxu1  ;;  %v1744_v53 = vpop.f32.mrb[13].mxu0 }
 0x222   : > { %v1350_v54 = vadd.f32 %v1349_v52, %v931_v47  ;;  %v1351_v55 = vpop.f32.mrb[14].mxu1  ;;  %v1391_v56 = vpop.f32.mrb[14].mxu0 }
 0x223   : > { %1398 = vst [vmem:[%s255_s14 + $0x20] sm:$0xff] %v1348_v50  ;;  %1400 = vst.msk [vmem:[%s255_s14 + $0x30] sm:$0xff] %vm675_vm1, %v1389_v51  ;;  %v1352_v57 = vpop.f32.mrb[15].mxu1  ;;  %v1745_v58 = vpop.f32.mrb[15].mxu0 }
 0x224   : > { %1399 = vst [vmem:[%s255_s14 + $0x28] sm:$0xff] %v1350_v54 }
 0x225   : > { %1966 = shalt.err (!%p1963_p9)
}
 0x226   : > { %s1967_s11 = scalar_lea.hbm %s2495_s10, 896  ;;  %s1971_s19 = scalar_lea.hbm %s2545_s6, 1792 }
 0x227   : > { %p1968_p10 = scmp.ne.s32.totalorder %s2495_s10, %s1967_s11  ;;  %p1972_p13 = scmp.lt.u32.totalorder %s2495_s10, %s2545_s6 }
 0x228   : > { %p1973_p0 = scmp.lt.u32.totalorder %s1971_s19, %s1967_s11  ;;  %p1975_p2 = scmp.lt.u32.totalorder %s1967_s11, %s2495_s10 }
 0x229   : > { %p1969_p11 = pnand %p1968_p10, %p2099_p5 }
 0x22a   : > { %p1974_p1 = por %p1973_p0, %p1972_p13 }
 0x22b   : > { %p1970_p12 = pneg %p1969_p11 }
 0x22c   : > { %p1976_p3 = por %p1975_p2, %p1974_p1 }
 0x22e   : > { %p1977_p4 = pnand %p1976_p3, %p1970_p12 }
 0x230   : > { %1980 = shalt.err (!%p1977_p4)
}
 0x231   : > { %1750 = dma.vmem_to_hbm [thread:$0]  (%p2099_p5), %s2497_s18, 896, %s2495_s10, %s1407_s25  }
 0x232 PF: > { %p1760_p7 = scmp.ge.s32.totalorder %s2019_s24, 2  ;;  %s1446_s17 = sand.u32 1, %s2007_s21  }
 0x233   : > { %s1447_s28 = scalar_lea.sflag [#allocation3], %s1446_s17 }
 0x234   : > { %p1754_p8 = pnand %p1760_p7, %p2103_p6 }
 0x236   : > { %1998 = dma.done.wait (!%p1754_p8), %s1447_s28, 128  }
 0x237   : > { %2000 = vsyncadd (!%p1754_p8), %s1447_s28, 4294967168  ;;  %s1456_s29 = scalar_lea.sflag [#allocation5], %s1446_s17 }
 0x238   : > { %2002 = dma.done.wait (!%p1754_p8), %s1456_s29, 896  }
 0x239   : > { %2004 = vsyncadd (!%p1754_p8), %s1456_s29, 4294966400  ;;  %p20_p5 = scmp.ge.s32.totalorder %s2086_s27, 4   ;;  %s2548_s21 = smov %s2011_s22 }
 0x23a   : > { %s2549_s22 = smov %s2015_s23  ;;  %s2550_s23 = smov %s2097_s30 }
 0x23b   : > { %s2551_s24 = smov %s2086_s27  ;;  %22 = sbr.rel (!%p20_p5) target bundleno = 5 (0x5), region = 92 }
 0x242   :  { %1461 = vsyncpa [#allocation3], 1 }
 0x243   :  { %1463 = vsyncpa [#allocation3 + $0x1], 1 }
 0x244   :  { %1464 = vsyncpa [#allocation5], 1 }
 0x245   :  { %1466 = vsyncpa [#allocation5 + $0x1], 1 }

</bundles_post_ra>
